<compile_context>
chip_gen: v6e
topology: v6e:2x2x1
jax: 0.10.0
libtpu: 0.0.40
codegen_flags: <defaults>
</compile_context>

<pallas_src>
from functools import partial

import jax
import jax.numpy as jnp
import numpy as np
from jax.experimental import pallas as pl
from jax.experimental.pallas import tpu as pltpu


def _round_up(x, m):
    return (x + m - 1) // m * m


def _hashnet_loss_kernel(u_ref, y_ref, bank_ref, out_ref,
                         acc_tot, acc_pos, acc_sim,
                         *, alpha, bit_p, n_class_p, num_train, tn,
                         steps_per_split):
    i = pl.program_id(0)          # split index ("parallel" -> both TCs on v7x)
    j = pl.program_id(1)          # tile index within the split ("arbitrary")

    @pl.when(j == 0)
    def _():
        acc_tot[...] = jnp.zeros_like(acc_tot)
        acc_pos[...] = jnp.zeros_like(acc_pos)
        acc_sim[...] = jnp.zeros_like(acc_sim)

    u = u_ref[...]                                    # (B, bit_p)      bank dtype
    y = y_ref[...]                                    # (B, n_class_p)  bank dtype
    Ub = bank_ref[0:bit_p, :]                         # (bit_p, tn)     U^T tile
    Yb = bank_ref[bit_p:bit_p + n_class_p, :]         # (n_class_p, tn) Y^T tile

    # dot_product = alpha * u @ U.T ; similarity = (y @ Y.T > 0)
    dp = alpha * jnp.dot(u, Ub, preferred_element_type=jnp.float32)      # (B, tn)
    sim = (jnp.dot(y, Yb, preferred_element_type=jnp.float32) > 0.0
           ).astype(jnp.float32)                                         # (B, tn)

    exp_loss = (jnp.log(1.0 + jnp.exp(-jnp.abs(dp)))
                + jnp.maximum(dp, 0.0)
                - sim * dp)

    # Mask padded bank columns (zero columns would contribute log(2) each to
    # the negative sum).  sim / pos contributions from padded columns are 0.
    col0 = (i * steps_per_split + j) * tn
    lane = jax.lax.broadcasted_iota(jnp.int32, exp_loss.shape, 1)
    valid = (lane + col0) < num_train

    acc_tot[...] += jnp.where(valid, exp_loss, 0.0)
    acc_pos[...] += jnp.where(sim > 0.0, exp_loss, 0.0)
    acc_sim[...] += sim

    @pl.when(j == steps_per_split - 1)
    def _():
        t = jnp.sum(acc_tot[...])     # total exp_loss over valid pairs
        p = jnp.sum(acc_pos[...])     # exp_loss over positive pairs
        s1 = jnp.sum(acc_sim[...])    # number of positive pairs
        r = jax.lax.broadcasted_iota(jnp.int32, out_ref.shape, 1)
        out_ref[...] = jnp.where(r == 0, t, jnp.where(r == 1, p, s1))


def init_hashnet_bank(num_train, bit, n_class, *, tn=4096, n_splits=2,
                      dtype=jnp.bfloat16):
    """Fused, transposed, padded bank: rows [0,bit_p) = U^T, rest = Y^T."""
    bit_p = _round_up(bit, 16)
    nc_p = _round_up(n_class, 16)
    tn = _round_up(tn, 128)
    n_pad = _round_up(num_train, tn * n_splits)
    return jnp.zeros((bit_p + nc_p, n_pad), dtype)


def hashnet_loss_pallas(u, y, ind, bank, *, num_train, bit, n_class, alpha,
                        scale=1.0, tn=4096, n_splits=2):
    """Functional HashNetLoss forward.  Returns (loss, updated_bank)."""
    bit_p = _round_up(bit, 16)
    nc_p = _round_up(n_class, 16)
    tn = _round_up(tn, 128)
    F = bit_p + nc_p

    n_pad = bank.shape[1]
    assert bank.shape[0] == F
    assert n_pad >= num_train and n_pad % (tn * n_splits) == 0
    steps_per_split = n_pad // tn // n_splits

    B = u.shape[0]
    dt = bank.dtype

    # torch: u = tanh(scale * u); self.U[ind,:] = u ; self.Y[ind,:] = y.float()
    u = jnp.tanh(scale * u.astype(jnp.float32))
    y = y.astype(jnp.float32)
    u_p = jnp.zeros((B, bit_p), jnp.float32).at[:, :bit].set(u)
    y_p = jnp.zeros((B, nc_p), jnp.float32).at[:, :n_class].set(y)
    cols = jnp.concatenate([u_p, y_p], axis=1).astype(dt).T          # (F, B)
    bank = bank.at[:, ind].set(cols)

    kernel = partial(_hashnet_loss_kernel, alpha=float(alpha), bit_p=bit_p,
                     n_class_p=nc_p, num_train=int(num_train), tn=tn,
                     steps_per_split=steps_per_split)

    partials = pl.pallas_call(
        kernel,
        out_shape=jax.ShapeDtypeStruct((n_splits, 3, 128), jnp.float32),
        grid_spec=pltpu.PrefetchScalarGridSpec(
            num_scalar_prefetch=0,
            grid=(n_splits, steps_per_split),
            in_specs=[
                pl.BlockSpec((B, bit_p), lambda i, j: (0, 0)),          # u (resident)
                pl.BlockSpec((B, nc_p), lambda i, j: (0, 0)),           # y (resident)
                pl.BlockSpec((F, tn),                                   # fused bank tile
                             lambda i, j: (0, i * steps_per_split + j)),
            ],
            out_specs=pl.BlockSpec((1, 3, 128), lambda i, j: (i, 0, 0)),
            scratch_shapes=[pltpu.VMEM((B, tn), jnp.float32)] * 3,
        ),
        compiler_params=pltpu.CompilerParams(
            dimension_semantics=("parallel", "arbitrary")),
    )(u_p.astype(dt), y_p.astype(dt), bank)

    total = jnp.sum(partials[:, 0, 0])
    pos = jnp.sum(partials[:, 1, 0])
    s1 = jnp.sum(partials[:, 2, 0])
    neg = total - pos
    s_all = jnp.float32(B * num_train)
    s0 = s_all - s1
    pos_term = jnp.where(s1 > 0.0, pos / jnp.maximum(s1, 1.0), 0.0)
    neg_term = jnp.where(s0 > 0.0, neg / jnp.maximum(s0, 1.0), 0.0)
    return pos_term + neg_term, bank


def hashnet_loss_ref(u, y, U, Y, ind, *, alpha, scale=1.0):
    """Pure-JAX reference mirroring the PyTorch forward exactly (f32 state)."""
    u = jnp.tanh(scale * u)
    y = y.astype(jnp.float32)
    U = U.at[ind, :].set(u)
    Y = Y.at[ind, :].set(y)
    similarity = (y @ Y.T > 0).astype(jnp.float32)
    dot_product = alpha * (u @ U.T)
    mask_pos = similarity > 0
    exp_loss = (jnp.log(1.0 + jnp.exp(-jnp.abs(dot_product)))
                + jnp.maximum(dot_product, 0.0)
                - similarity * dot_product)
    S1 = jnp.sum(mask_pos.astype(jnp.float32))
    S0 = jnp.sum((~mask_pos).astype(jnp.float32))
    S = S0 + S1
    exp_loss = jnp.where(mask_pos, exp_loss * (S / S1), exp_loss * (S / S0))
    return jnp.sum(exp_loss) / S


if __name__ == "__main__":
    # Small deterministic problem (n_class deliberately not a multiple of 16,
    # num_train deliberately not a multiple of the tile to exercise masking).
    num_train, bit, n_class, B = 3000, 32, 10, 8
    alpha, tn, n_splits = 0.1, 512, 2

    key = jax.random.PRNGKey(0)
    k1, k2, k3 = jax.random.split(key, 3)
    u = jax.random.normal(k1, (B, bit), dtype=jnp.float32)
    labels = jax.random.randint(k2, (B,), 0, n_class)
    y = jax.nn.one_hot(labels, n_class, dtype=jnp.float32)
    ind = jax.random.permutation(k3, num_train)[:B]

    # Reference (torch semantics, f32 banks initialized to zeros as in __init__).
    ref = hashnet_loss_ref(u, y,
                           jnp.zeros((num_train, bit), jnp.float32),
                           jnp.zeros((num_train, n_class), jnp.float32),
                           ind, alpha=alpha)
    ref = np.asarray(jax.block_until_ready(ref))

    # 1) f32 bank: near-exact check of the kernel math.
    bank32 = init_hashnet_bank(num_train, bit, n_class, tn=tn,
                               n_splits=n_splits, dtype=jnp.float32)
    loss32, _ = hashnet_loss_pallas(u, y, ind, bank32, num_train=num_train,
                                    bit=bit, n_class=n_class, alpha=alpha,
                                    tn=tn, n_splits=n_splits)
    loss32 = np.asarray(jax.block_until_ready(loss32))
    assert np.allclose(loss32, ref, rtol=1e-4, atol=1e-4), (float(loss32), float(ref))

    # 2) bf16 bank (the fast, production configuration): looser tolerance.
    bank16 = init_hashnet_bank(num_train, bit, n_class, tn=tn,
                               n_splits=n_splits, dtype=jnp.bfloat16)
    loss16, bank16 = hashnet_loss_pallas(u, y, ind, bank16, num_train=num_train,
                                         bit=bit, n_class=n_class, alpha=alpha,
                                         tn=tn, n_splits=n_splits)
    loss16 = np.asarray(jax.block_until_ready(loss16))
    assert np.allclose(loss16, ref, rtol=3e-3, atol=3e-3), (float(loss16), float(ref))

    print("KERNEL_OK")
</pallas_src>

<mosaic_0001>
module attributes {stable_mosaic.version = 11 : i64} {
  func.func @_hashnet_loss_kernel(%arg0: i32, %arg1: i32, %arg2: memref<8x32xf32, #tpu.memory_space<vmem>>, %arg3: memref<8x16xf32, #tpu.memory_space<vmem>>, %arg4: memref<48x512xf32, #tpu.memory_space<vmem>>, %arg5: memref<1x3x128xf32, #tpu.memory_space<vmem>>, %arg6: memref<8x512xf32, #tpu.memory_space<vmem>>, %arg7: memref<8x512xf32, #tpu.memory_space<vmem>>, %arg8: memref<8x512xf32, #tpu.memory_space<vmem>>) attributes {dimension_semantics = [#tpu.dimension_semantics<parallel>, #tpu.dimension_semantics<arbitrary>], iteration_bounds = array<i64: 2, 3>, scalar_prefetch = 0 : i64, scratch_operands = 3 : i64, tpu.core_type = #tpu.core_type<tc>, window_params = [{pipeline_mode = #tpu.pipeline_mode<synchronous>, transform_indices = @transform_0, window_bounds = array<i64: 8, 32>}, {pipeline_mode = #tpu.pipeline_mode<synchronous>, transform_indices = @transform_1, window_bounds = array<i64: 8, 16>}, {transform_indices = @transform_2, window_bounds = array<i64: 48, 512>}, {transform_indices = @transform_3, window_bounds = array<i64: 1, 3, 128>}]} {
    %c0_i32 = arith.constant 0 : i32
    %0 = arith.cmpi eq, %arg1, %c0_i32 : i32
    %1 = arith.extui %0 : i1 to i32
    %c0_i32_0 = arith.constant 0 : i32
    %2 = arith.cmpi ne, %1, %c0_i32_0 : i32
    scf.if %2 {
      %cst_29 = arith.constant 0.000000e+00 : f32
      %53 = vector.broadcast %cst_29 : f32 to vector<8x512xf32>
      %c0_30 = arith.constant 0 : index
      %c0_31 = arith.constant 0 : index
      %54 = vector.load %arg6[%c0_30, %c0_31] : memref<8x512xf32, #tpu.memory_space<vmem>>, vector<8x512xf32>
      tpu.vector_store %arg6[%c0_30, %c0_31], %53 {strides = array<i32>} : memref<8x512xf32, #tpu.memory_space<vmem>>, vector<8x512xf32>,
      %cst_32 = arith.constant 0.000000e+00 : f32
      %55 = vector.broadcast %cst_32 : f32 to vector<8x512xf32>
      %c0_33 = arith.constant 0 : index
      %c0_34 = arith.constant 0 : index
      %56 = vector.load %arg7[%c0_33, %c0_34] : memref<8x512xf32, #tpu.memory_space<vmem>>, vector<8x512xf32>
      tpu.vector_store %arg7[%c0_33, %c0_34], %55 {strides = array<i32>} : memref<8x512xf32, #tpu.memory_space<vmem>>, vector<8x512xf32>,
      %cst_35 = arith.constant 0.000000e+00 : f32
      %57 = vector.broadcast %cst_35 : f32 to vector<8x512xf32>
      %c0_36 = arith.constant 0 : index
      %c0_37 = arith.constant 0 : index
      %58 = vector.load %arg8[%c0_36, %c0_37] : memref<8x512xf32, #tpu.memory_space<vmem>>, vector<8x512xf32>
      tpu.vector_store %arg8[%c0_36, %c0_37], %57 {strides = array<i32>} : memref<8x512xf32, #tpu.memory_space<vmem>>, vector<8x512xf32>,
    } else {
    }
    %c0 = arith.constant 0 : index
    %c0_1 = arith.constant 0 : index
    %3 = vector.load %arg2[%c0, %c0_1] : memref<8x32xf32, #tpu.memory_space<vmem>>, vector<8x32xf32>
    %c0_2 = arith.constant 0 : index
    %c0_3 = arith.constant 0 : index
    %4 = vector.load %arg3[%c0_2, %c0_3] : memref<8x16xf32, #tpu.memory_space<vmem>>, vector<8x16xf32>
    %c0_4 = arith.constant 0 : index
    %c0_5 = arith.constant 0 : index
    %5 = vector.load %arg4[%c0_4, %c0_5] : memref<48x512xf32, #tpu.memory_space<vmem>>, vector<32x512xf32>
    %c32 = arith.constant 32 : index
    %c0_6 = arith.constant 0 : index
    %6 = vector.load %arg4[%c32, %c0_6] : memref<48x512xf32, #tpu.memory_space<vmem>>, vector<16x512xf32>
    %cst = arith.constant dense<0.000000e+00> : vector<8x512xf32>
    %7 = tpu.matmul %3, %5, %cst {dimension_numbers = #tpu.dot_dimension_numbers<[1], [0], [0], [1], [0, 0, 1, 1], [], []>} : vector<8x32xf32>, vector<32x512xf32>, vector<8x512xf32> -> vector<8x512xf32>
    %cst_7 = arith.constant 1.000000e-01 : f32
    %8 = vector.broadcast %cst_7 : f32 to vector<8x512xf32>
    %9 = arith.mulf %8, %7 : vector<8x512xf32>
    %cst_8 = arith.constant dense<0.000000e+00> : vector<8x512xf32>
    %10 = tpu.matmul %4, %6, %cst_8 {dimension_numbers = #tpu.dot_dimension_numbers<[1], [0], [0], [1], [0, 0, 1, 1], [], []>} : vector<8x16xf32>, vector<16x512xf32>, vector<8x512xf32> -> vector<8x512xf32>
    %cst_9 = arith.constant 0.000000e+00 : f32
    %11 = vector.broadcast %cst_9 : f32 to vector<8x512xf32>
    %12 = arith.cmpf ogt, %10, %11 : vector<8x512xf32>
    %13 = arith.extui %12 : vector<8x512xi1> to vector<8x512xi32>
    %14 = arith.sitofp %13 : vector<8x512xi32> to vector<8x512xf32>
    %15 = math.absf %9 : vector<8x512xf32>
    %cst_10 = arith.constant 0.000000e+00 : f32
    %16 = vector.broadcast %cst_10 : f32 to vector<8x512xf32>
    %17 = arith.subf %16, %15 : vector<8x512xf32>
    %18 = math.exp %17 : vector<8x512xf32>
    %cst_11 = arith.constant 1.000000e+00 : f32
    %19 = vector.broadcast %cst_11 : f32 to vector<8x512xf32>
    %20 = arith.addf %19, %18 : vector<8x512xf32>
    %21 = math.log %20 : vector<8x512xf32>
    %cst_12 = arith.constant 0.000000e+00 : f32
    %22 = vector.broadcast %cst_12 : f32 to vector<8x512xf32>
    %23 = arith.maximumf %9, %22 : vector<8x512xf32>
    %24 = arith.addf %21, %23 : vector<8x512xf32>
    %25 = arith.mulf %14, %9 : vector<8x512xf32>
    %26 = arith.subf %24, %25 : vector<8x512xf32>
    %c3_i32 = arith.constant 3 : i32
    %27 = arith.muli %arg0, %c3_i32 : i32
    %28 = arith.addi %27, %arg1 : i32
    %c512_i32 = arith.constant 512 : i32
    %29 = arith.muli %28, %c512_i32 : i32
    %30 = tpu.iota {dimensions = array<i32: 1>} : vector<8x512xi32>
    %31 = vector.broadcast %29 : i32 to vector<8x512xi32>
    %32 = arith.addi %30, %31 : vector<8x512xi32>
    %c3000_i32 = arith.constant 3000 : i32
    %33 = vector.broadcast %c3000_i32 : i32 to vector<8x512xi32>
    %34 = arith.cmpi slt, %32, %33 : vector<8x512xi32>
    %c0_13 = arith.constant 0 : index
    %c0_14 = arith.constant 0 : index
    %35 = vector.load %arg6[%c0_13, %c0_14] : memref<8x512xf32, #tpu.memory_space<vmem>>, vector<8x512xf32>
    %cst_15 = arith.constant 0.000000e+00 : f32
    %36 = vector.broadcast %cst_15 : f32 to vector<8x512xf32>
    %37 = arith.select %34, %26, %36 : vector<8x512xi1>, vector<8x512xf32>
    %38 = arith.addf %35, %37 : vector<8x512xf32>
    %c0_16 = arith.constant 0 : index
    %c0_17 = arith.constant 0 : index
    %39 = vector.load %arg6[%c0_16, %c0_17] : memref<8x512xf32, #tpu.memory_space<vmem>>, vector<8x512xf32>
    tpu.vector_store %arg6[%c0_16, %c0_17], %38 {strides = array<i32>} : memref<8x512xf32, #tpu.memory_space<vmem>>, vector<8x512xf32>,
    %c0_18 = arith.constant 0 : index
    %c0_19 = arith.constant 0 : index
    %40 = vector.load %arg7[%c0_18, %c0_19] : memref<8x512xf32, #tpu.memory_space<vmem>>, vector<8x512xf32>
    %cst_20 = arith.constant 0.000000e+00 : f32
    %41 = vector.broadcast %cst_20 : f32 to vector<8x512xf32>
    %42 = arith.cmpf ogt, %14, %41 : vector<8x512xf32>
    %cst_21 = arith.constant 0.000000e+00 : f32
    %43 = vector.broadcast %cst_21 : f32 to vector<8x512xf32>
    %44 = arith.select %42, %26, %43 : vector<8x512xi1>, vector<8x512xf32>
    %45 = arith.addf %40, %44 : vector<8x512xf32>
    %c0_22 = arith.constant 0 : index
    %c0_23 = arith.constant 0 : index
    %46 = vector.load %arg7[%c0_22, %c0_23] : memref<8x512xf32, #tpu.memory_space<vmem>>, vector<8x512xf32>
    tpu.vector_store %arg7[%c0_22, %c0_23], %45 {strides = array<i32>} : memref<8x512xf32, #tpu.memory_space<vmem>>, vector<8x512xf32>,
    %c0_24 = arith.constant 0 : index
    %c0_25 = arith.constant 0 : index
    %47 = vector.load %arg8[%c0_24, %c0_25] : memref<8x512xf32, #tpu.memory_space<vmem>>, vector<8x512xf32>
    %48 = arith.addf %47, %14 : vector<8x512xf32>
    %c0_26 = arith.constant 0 : index
    %c0_27 = arith.constant 0 : index
    %49 = vector.load %arg8[%c0_26, %c0_27] : memref<8x512xf32, #tpu.memory_space<vmem>>, vector<8x512xf32>
    tpu.vector_store %arg8[%c0_26, %c0_27], %48 {strides = array<i32>} : memref<8x512xf32, #tpu.memory_space<vmem>>, vector<8x512xf32>,
    %c2_i32 = arith.constant 2 : i32
    %50 = arith.cmpi eq, %arg1, %c2_i32 : i32
    %51 = arith.extui %50 : i1 to i32
    %c0_i32_28 = arith.constant 0 : i32
    %52 = arith.cmpi ne, %51, %c0_i32_28 : i32
    scf.if %52 {
      %c0_29 = arith.constant 0 : index
      %c0_30 = arith.constant 0 : index
      %53 = vector.load %arg6[%c0_29, %c0_30] : memref<8x512xf32, #tpu.memory_space<vmem>>, vector<8x512xf32>
      %54 = vector.shape_cast %53 : vector<8x512xf32> to vector<1x8x512xf32>
      %cst_31 = arith.constant dense<0.000000e+00> : vector<1xf32>
      %55 = vector.multi_reduction <add>, %54, %cst_31 [1, 2] : vector<1x8x512xf32> to vector<1xf32>
      %56 = vector.shape_cast %55 : vector<1xf32> to vector<1x1x1xf32>
      %57 = vector.extract %56[0, 0, 0] : f32 from vector<1x1x1xf32>
      %c0_32 = arith.constant 0 : index
      %c0_33 = arith.constant 0 : index
      %58 = vector.load %arg7[%c0_32, %c0_33] : memref<8x512xf32, #tpu.memory_space<vmem>>, vector<8x512xf32>
      %59 = vector.shape_cast %58 : vector<8x512xf32> to vector<1x8x512xf32>
      %cst_34 = arith.constant dense<0.000000e+00> : vector<1xf32>
      %60 = vector.multi_reduction <add>, %59, %cst_34 [1, 2] : vector<1x8x512xf32> to vector<1xf32>
      %61 = vector.shape_cast %60 : vector<1xf32> to vector<1x1x1xf32>
      %62 = vector.extract %61[0, 0, 0] : f32 from vector<1x1x1xf32>
      %c0_35 = arith.constant 0 : index
      %c0_36 = arith.constant 0 : index
      %63 = vector.load %arg8[%c0_35, %c0_36] : memref<8x512xf32, #tpu.memory_space<vmem>>, vector<8x512xf32>
      %64 = vector.shape_cast %63 : vector<8x512xf32> to vector<1x8x512xf32>
      %cst_37 = arith.constant dense<0.000000e+00> : vector<1xf32>
      %65 = vector.multi_reduction <add>, %64, %cst_37 [1, 2] : vector<1x8x512xf32> to vector<1xf32>
      %66 = vector.shape_cast %65 : vector<1xf32> to vector<1x1x1xf32>
      %67 = vector.extract %66[0, 0, 0] : f32 from vector<1x1x1xf32>
      %68 = tpu.iota {dimensions = array<i32: 1>} : vector<1x3x128xi32>
      %c0_i32_38 = arith.constant 0 : i32
      %69 = vector.broadcast %c0_i32_38 : i32 to vector<1x3x128xi32>
      %70 = arith.cmpi eq, %68, %69 : vector<1x3x128xi32>
      %c1_i32 = arith.constant 1 : i32
      %71 = vector.broadcast %c1_i32 : i32 to vector<1x3x128xi32>
      %72 = arith.cmpi eq, %68, %71 : vector<1x3x128xi32>
      %73 = vector.broadcast %62 : f32 to vector<1x3x128xf32>
      %74 = vector.broadcast %67 : f32 to vector<1x3x128xf32>
      %75 = arith.select %72, %73, %74 : vector<1x3x128xi1>, vector<1x3x128xf32>
      %76 = vector.broadcast %57 : f32 to vector<1x3x128xf32>
      %77 = arith.select %70, %76, %75 : vector<1x3x128xi1>, vector<1x3x128xf32>
      %c0_39 = arith.constant 0 : index
      %c0_40 = arith.constant 0 : index
      %c0_41 = arith.constant 0 : index
      %78 = vector.load %arg5[%c0_39, %c0_40, %c0_41] : memref<1x3x128xf32, #tpu.memory_space<vmem>>, vector<1x3x128xf32>
      tpu.vector_store %arg5[%c0_39, %c0_40, %c0_41], %77 {strides = array<i32>} : memref<1x3x128xf32, #tpu.memory_space<vmem>>, vector<1x3x128xf32>,
    } else {
    }
    return
  }
  func.func @transform_0(%arg0: i32, %arg1: i32) -> (i32, i32) {
    %c0_i32 = arith.constant 0 : i32
    %c0_i32_0 = arith.constant 0 : i32
    %c0_i32_1 = arith.constant 0 : i32
    return %c0_i32, %c0_i32_0 : i32, i32
  }
  func.func @transform_1(%arg0: i32, %arg1: i32) -> (i32, i32) {
    %c0_i32 = arith.constant 0 : i32
    %c0_i32_0 = arith.constant 0 : i32
    %c0_i32_1 = arith.constant 0 : i32
    return %c0_i32, %c0_i32_0 : i32, i32
  }
  func.func @transform_2(%arg0: i32, %arg1: i32) -> (i32, i32) {
    %c3_i32 = arith.constant 3 : i32
    %0 = arith.muli %arg0, %c3_i32 : i32
    %1 = arith.addi %0, %arg1 : i32
    %c0_i32 = arith.constant 0 : i32
    %c0_i32_0 = arith.constant 0 : i32
    return %c0_i32, %1 : i32, i32
  }
  func.func @transform_3(%arg0: i32, %arg1: i32) -> (i32, i32, i32) {
    %c0_i32 = arith.constant 0 : i32
    %c0_i32_0 = arith.constant 0 : i32
    %c0_i32_1 = arith.constant 0 : i32
    return %arg0, %c0_i32, %c0_i32_0 : i32, i32, i32
  }
}

</mosaic_0001>

<bundles_post_ra>
// kernel: tpu_custom_call.1
= control target key start
LH: loop header
LB: loop body
LE: loop exit
PB: predicated region body
PF: predicated region fallthrough
CT: control target
= control target key end

     0   :  { %s1440_s0 = inlined_call_operand.hbm [shape: f32[8,32], index: 0, kind: input, shape index: {}]   ;;  %s1441_s1 = inlined_call_operand.hbm [shape: f32[8,16], index: 1, kind: input, shape index: {}]   ;;  %s1442_s2 = inlined_call_operand.hbm [shape: f32[48,3072], index: 2, kind: input, shape index: {}]   ;;  %s1443_s3 = inlined_call_operand.vmem [shape: f32[2,3,128], index: 3, kind: output, shape index: {}]  }
   0x1   :  { %1449 = sst [smem:[#allocation13_spill]] %s1440_s0 }
   0x2   :  { %8 = vsyncpa [#allocation6], 0 }
   0x3   :  { %9 = vsyncpa [#allocation8], 0  ;;  %s1182_s12 = smov 0   ;;  %s1184_s13 = smov 0  }
   0x4   :  { %s1186_s14 = smov 0   ;;  %s1188_s15 = smov 0  }
   0x5   :  { %s1190_s16 = smov 0   ;;  %s1192_s17 = smov 0  }
   0x6   :  { %s1194_s18 = smov 0   ;;  %s1196_s19 = smov 0  }
   0x7 LB: > { %s1448_s20 = sadd.s32 4294967295, %s1152_s19   ;;  %p87_p0 = scmp.ne.s32.totalorder %s1132_s14, %s1128_s13  ;;  %s1152_s19 = sphi %s1196_s19, %s15_s19   ;;  %s1148_s18 = sphi %s1194_s18, %s1467_s18   ;;  %s1144_s17 = sphi %s1192_s17, %s1466_s17   ;;  %s1140_s16 = sphi %s1190_s16, %s1465_s16   ;;  %s1136_s15 = sphi %s1188_s15, %s1464_s15   ;;  %s1132_s14 = sphi %s1186_s14, %s1463_s14   ;;  %s1128_s13 = sphi %s1184_s13, %s1462_s13   ;;  %s1124_s12 = sphi %s1182_s12, %s1461_s12  }
   0x8   : > { %p88_p1 = scmp.eq.s32.totalorder %s1152_s19, 0  ;;  %p93_p2 = scmp.ne.s32.totalorder %s1128_s13, %s1124_s12 }
   0x9   : > { %p1227_p3 = scmp.eq.s32.totalorder %s1448_s20, 0  ;;  %p853_p5 = scmp.ge.s32.totalorder %s1152_s19, 1 }
   0xa   : > { %p89_p4 = por %p88_p1, %p87_p0  ;;  %p130_p7 = scmp.lt.s32.totalorder %s1152_s19, 7 }
   0xb   : > { %s1450_s21 = scalar_select %p1227_p3, 1, 0 }
   0xc   : > { %p1234_p6 = por %p1227_p3, %p93_p2  ;;  %p1239_p8 = pnand %p853_p5, %p130_p7 }
   0xd   : > { %s1154_s24 = smov [#allocation5]   ;;  %p908_p10 = scmp.lt.s32.totalorder %s1152_s19, 6 }
   0xe   : > { %s1451_s22 = scalar_select %p1234_p6, 1, 0 }
   0xf   : > { %s1452_s23 = scalar_select %p1239_p8, 1, 0 }
  0x10   : > { %s143_s25 = sshll.u32 %s1154_s24, 4  ;;  %p895_p9 = pneg %p1239_p8  ;;  %s144_s25 = int_to_ptr.vmem [resolvable:$true] %s143_s25 }
  0x11   : > { %p1252_p12 = pnand %p908_p10, %p89_p4  ;;  %s1155_s28 = smov [#allocation7]  }
  0x12   : > { %p1248_p11 = pnand %p895_p9, %p1227_p3  ;;  %s154_s29 = sshll.u32 %s1155_s28, 4  ;;  %s155_s29 = int_to_ptr.vmem [resolvable:$true] %s154_s29 }
  0x13   : > { %s1009_s30 = scalar_lea.vmem %s144_s25, 128  ;;  %p1017_p5 = scmp.lt.s32.totalorder %s144_s25, %s144_s25 }
  0x14   : > { %p1000_p13 = pneg %p1248_p11  ;;  %p1010_p0 = scmp.ne.s32.totalorder %s144_s25, %s1009_s30 }
  0x15   : > { %p1018_p7 = scmp.lt.s32.totalorder %s1009_s30, %s1009_s30 }
  0x16   : > { %p1012_p1 = pnand %p1010_p0, %p1000_p13 }
  0x17   : > { %p1019_p9 = por %p1018_p7, %p1017_p5 }
  0x18   : > { %p1013_p2 = pneg %p1012_p1 }
  0x1a   : > { %p1020_p6 = pnand %p1019_p9, %p1013_p2 }
  0x1c   : > { %1023 = shalt.err (!%p1020_p6)
}
  0x1d   : > { %s1455_s0 = sld [smem:[#allocation13_spill]]  ;;  %s1035_s6 = scalar_lea.vmem %s155_s29, 128 }
  0x1e   : > { %p1036_p4 = scmp.ne.s32.totalorder %s155_s29, %s1035_s6  ;;  %p1043_p1 = scmp.lt.s32.totalorder %s155_s29, %s155_s29 }
  0x1f   : > { %p1044_p3 = scmp.lt.s32.totalorder %s1035_s6, %s1035_s6 }
  0x20   : > { %p1038_p10 = pnand %p1036_p4, %p1000_p13 }
  0x21   : > { %p1045_p8 = por %p1044_p3, %p1043_p1 }
  0x22   : > { %p1039_p0 = pneg %p1038_p10 }
  0x23   : > { %898 = dma.hbm_to_vmem [thread:$0]  (!%p1248_p11), %s1455_s0, 128, %s144_s25, [#allocation6]  }
  0x24   : > { %p1046_p5 = pnand %p1045_p8, %p1039_p0 }
  0x26   : > { %1049 = shalt.err (!%p1046_p5)
}
  0x27   : > { %901 = dma.hbm_to_vmem [thread:$0]  (!%p1248_p11), %s1441_s1, 128, %s155_s29, [#allocation8]  }
  0x28   : > { %s24_s9 = sadd.s32 1, %s1144_s17  ;;  %s73_s10 = smul.u32 3, %s1148_s18 }
  0x29   : > { %p25_p6 = scmp.ge.s32.totalorder %s24_s9, 3  ;;  %s27_s11 = sadd.s32 1, %s1148_s18 }
  0x2a   : > { %s74_s12 = sadd.s32 %s1144_s17, %s73_s10  ;;  %s165_s24 = sand.u32 1, %s1152_s19  }
  0x2b   : > { %s1469_s9 = smov (%p25_p6, %s24_s9), 0  ;;  %s1471_s11 = smov (!%p25_p6, %s27_s11), %s1148_s18 }
  0x2c   : > { %s167_s25 = sand.u32 1, %s1132_s14   ;;  %s876_s26 = sshll.u32 %s74_s12, 9 }
  0x2d   : > { %p29_p3 = scmp.ge.s32.totalorder %s1471_s11, 2  ;;  %s877_s28 = smul.u32 192, %s167_s25 }
  0x2e   : > { %s1286_s29 = scalar_lea.hbm %s1442_s2, %s876_s26  ;;  %s80_s10 = sadd.s32 1, %s1132_s14 }
  0x2f   : > { %s1473_s11 = smov (%p29_p3, %s1471_s11), 0  ;;  %s169_s6 = scalar_lea.vmem [#allocation9], %s877_s28 }
  0x30   : > { %s75_s5 = smul.u32 3, %s1473_s11  ;;  %s178_s7 = sshll.u32 %s169_s6, 4  ;;  %s179_s7 = int_to_ptr.vmem [resolvable:$true] %s178_s7 }
  0x31   : > { %s166_s25 = scalar_lea.sflag [#allocation6], %s165_s24  ;;  %p1052_p11 = pneg %p1252_p12 }
  0x32   : > { %s76_s8 = sadd.s32 %s75_s5, %s1469_s9  ;;  %s1063_s30 = scalar_lea.vmem %s179_s7, 3072 }
  0x33   : > { %s77_s20 = ssub.s32 %s74_s12, %s76_s8  ;;  %p1064_p13 = scmp.ne.s32.totalorder %s179_s7, %s1063_s30 }
  0x34   : > { %p1293_p8 = scmp.eq.s32.totalorder %s77_s20, 0  ;;  %s1156_s26 = smov [#allocation9]  }
  0x35   : > { %p1066_p2 = pnand %p1064_p13, %p1052_p11  ;;  %s1068_s4 = sshll.u32 %s1156_s26, 4  ;;  %s1069_s4 = int_to_ptr.vmem [resolvable:$false] %s1068_s4 }
  0x36   : > { %s1070_s28 = scalar_lea.vmem %s1069_s4, 6144  ;;  %p1071_p9 = scmp.lt.s32.totalorder %s179_s7, %s1069_s4 }
  0x37   : > { %p1067_p7 = pneg %p1066_p2  ;;  %p1072_p4 = scmp.lt.s32.totalorder %s1070_s28, %s1063_s30 }
  0x39   : > { %p1073_p10 = por %p1072_p4, %p1071_p9 }
  0x3b   : > { %p1074_p0 = pnand %p1073_p10, %p1067_p7 }
  0x3d   : > { %1077 = shalt.err (!%p1074_p0)
}
  0x3e   : > { %s1157_s20 = smov 3072   ;;  %s1158_s12 = smov 512  }
  0x3f   : > { %s1159_s24 = smov 32   ;;  %p1457_p1 = scmp.ne.s32.totalorder %s1452_s23, 0 }
  0x40   : > { %905 = dma.hbm_to_vmem [thread:$0]  (!%p1252_p12), %s1286_s29, 3072, %s179_s7, %s166_s25, %s1157_s20, %s1158_s12, %s1159_s24  }
  0x41   : > { %s1305_s5 = scalar_select %p1293_p8, %s1132_s14, %s80_s10  }
  0x42   : > { %190 = sbr.rel (%p1457_p1) target bundleno = 571 (0x23b), region = 32  ;;  %p1458_p5 = scmp.ne.s32.totalorder (!%p1457_p1), %s1450_s21, 0 }
  0x47   : > { %1111 = dma.done.wait (%p1458_p5), [#allocation6], 128  }
  0x48   : > { %1113 = vsyncadd (%p1458_p5), [#allocation6], 4294967168 }
  0x49   : > { %1115 = dma.done.wait (%p1458_p5), [#allocation8], 128  }
  0x4a   : > { %1117 = vsyncadd (%p1458_p5), [#allocation8], 4294967168  ;;  %s1459_s27 = sadd.s32 4294967295, %s1152_s19   ;;  %s202_s29 = sand.u32 1, %s1128_s13  }
  0x4b   : > { %s200_s0 = sand.u32 1, %s1459_s27   ;;  %s878_s23 = smul.u32 192, %s202_s29 }
  0x4c   : > { %s201_s6 = scalar_lea.sflag [#allocation6], %s200_s0  ;;  %p1460_p12 = scmp.ne.s32.totalorder %s1451_s22, 0 }
  0x4d   : > { %s1320_s7 = scalar_lea.vmem [#allocation9], %s878_s23 }
  0x4e   : > { %1119 = dma.done.wait (%p1460_p12), %s201_s6, 3072  }
  0x4f   : > { %1121 = vsyncadd (%p1460_p12), %s201_s6, 4294964224  ;;  %p229_p6 = scmp.lt.s32.totalorder %s1140_s16, 1  ;;  %p863_p3 = scmp.ne.s32.totalorder %s1136_s15, 0 }
  0x51   : > { %s230_s21 = scalar_select %p229_p6, %s1140_s16, 1 }
  0x52   : > { %236 = sbr.rel (%p863_p3) target bundleno = 94 (0x5e), region = 48 }
  0x53   : > { %s862_s8 = sshll.u32 %s230_s21, 2 }
  0x54   : > { %s1331_s30 = scalar_lea.vmem %s1443_s3, %s862_s8 }
  0x57   : > { %v1160_v0 = vmov 0.0  }
  0x58   : > { %237 = vst [vmem:[#allocation2 + $0x10] sm:$0xff] %v1160_v0  ;;  %238 = vst [vmem:[#allocation2] sm:$0xff] %v1160_v0 }
  0x59   : > { %239 = vst [vmem:[#allocation2 + $0x18] sm:$0xff] %v1160_v0  ;;  %240 = vst [vmem:[#allocation2 + $0x8] sm:$0xff] %v1160_v0 }
  0x5a   : > { %241 = vst [vmem:[#allocation3] sm:$0xff] %v1160_v0  ;;  %242 = vst [vmem:[#allocation3 + $0x18] sm:$0xff] %v1160_v0 }
  0x5b   : > { %243 = vst [vmem:[#allocation3 + $0x8] sm:$0xff] %v1160_v0  ;;  %244 = vst [vmem:[#allocation3 + $0x10] sm:$0xff] %v1160_v0 }
  0x5c   : > { %245 = vst [vmem:[#allocation4] sm:$0xff] %v1160_v0  ;;  %246 = vst [vmem:[#allocation4 + $0x8] sm:$0xff] %v1160_v0 }
  0x5d   : > { %247 = vst [vmem:[#allocation4 + $0x10] sm:$0xff] %v1160_v0  ;;  %248 = vst [vmem:[#allocation4 + $0x18] sm:$0xff] %v1160_v0 }
  0x5e PF: > { %v264_v1 = vld [vmem:[%s1320_s7 + $0x68] sm:$0xff]  ;;  %v266_v2 = vld [vmem:[%s1320_s7 + $0x78] sm:$0xff]  ;;  %v263_v3 = vld [vmem:[%s1320_s7 + $0x60] sm:$0xff]  ;;  %vm275_vm0 = vcmask 261120   ;;  %v1161_v18 = vmov 0.0   ;;  %vm425_vm1 = vcmask 130048  }
  0x5f   : > { %303 = vmatprep.subr.mxu0 %v264_v1  ;;  %374 = vmatprep.subr.mxu1 %v266_v2  ;;  %v265_v4 = vld [vmem:[%s1320_s7 + $0x70] sm:$0xff]  ;;  %v260_v5 = vld [vmem:[%s1320_s7 + $0x48] sm:$0xff]  ;;  %v262_v6 = vld [vmem:[%s1320_s7 + $0x58] sm:$0xff]  ;;  %s627_s22 = smul.u32 3, %s1140_s16  ;;  %p873_p8 = scmp.ne.s32.totalorder %s1136_s15, 2 }
  0x60   : > { %304 = vmatpush1.msra.mxu0 %v263_v3  ;;  %375 = vmatpush1.msra.mxu1 %v265_v4  ;;  %v259_v7 = vld [vmem:[%s1320_s7 + $0x40] sm:$0xff]  ;;  %v261_v8 = vld [vmem:[%s1320_s7 + $0x50] sm:$0xff]  ;;  %v256_v9 = vld [vmem:[%s1320_s7 + $0x28] sm:$0xff]  ;;  %v630_v4 = vlaneseq }
  0x61   : > { %305 = vmatprep.subr.mxu0 %v260_v5  ;;  %376 = vmatprep.subr.mxu1 %v262_v6  ;;  %v258_v10 = vld [vmem:[%s1320_s7 + $0x38] sm:$0xff]  ;;  %v255_v11 = vld [vmem:[%s1320_s7 + $0x20] sm:$0xff]  ;;  %v257_v12 = vld [vmem:[%s1320_s7 + $0x30] sm:$0xff]  ;;  %s628_s26 = sadd.s32 %s1136_s15, %s627_s22 }
  0x62   : > { %306 = vmatpush1.msra.mxu0 %v259_v7  ;;  %377 = vmatpush1.msra.mxu1 %v261_v8  ;;  %v252_v13 = vld [vmem:[%s1320_s7 + $0x8] sm:$0xff]  ;;  %v254_v14 = vld [vmem:[%s1320_s7 + $0x18] sm:$0xff]  ;;  %v251_v15 = vld [vmem:[%s1320_s7] sm:$0xff]  ;;  %s872_s4 = sshll.u32 %s628_s26, 9 }
  0x63   : > { %307 = vmatprep.subr.mxu0 %v256_v9  ;;  %378 = vmatprep.subr.mxu1 %v258_v10  ;;  %v253_v16 = vld [vmem:[%s1320_s7 + $0x10] sm:$0xff]  ;;  %v272_v19 = vld [vmem:[%s1320_s7 + $0xa8] sm:$0xff]  ;;  %v274_v20 = vld [vmem:[%s1320_s7 + $0xb8] sm:$0xff]  ;;  %v631_v9 = vand.u32 127, %v630_v4 }
  0x64   : > { %308 = vmatpush1.msra.mxu0 %v255_v11  ;;  %379 = vmatpush1.msra.mxu1 %v257_v12  ;;  %v249_v17 = vld [vmem:[#allocation5] sm:$0xff]  ;;  %v271_v21 = vld [vmem:[%s1320_s7 + $0xa0] sm:$0xff]  ;;  %v268_v23 = vld [vmem:[%s1320_s7 + $0x88] sm:$0xff]  ;;  %v635_v11 = vstv %s872_s4 }
  0x65   : > { %309 = vmatprep.subr.mxu0 %v252_v13  ;;  %380 = vmatprep.subr.mxu1 %v254_v14  ;;  %v273_v22 = vld [vmem:[%s1320_s7 + $0xb0] sm:$0xff]  ;;  %v270_v24 = vld [vmem:[%s1320_s7 + $0x98] sm:$0xff]  ;;  %v267_v25 = vld [vmem:[%s1320_s7 + $0x80] sm:$0xff]  ;;  %v633_v10 = vadd.s32 256, %v631_v9  ;;  %v632_v12 = vadd.s32 128, %v631_v9  ;;  %v634_v13 = vadd.s32 384, %v631_v9  ;;  %v636_v14 = vadd.s32 %v635_v11, %v631_v9 }
  0x66   : > { %310 = vmatpush1.msra.mxu0 %v251_v15  ;;  %343 = vmatprep.mubr.f32.mxu0 %v1161_v18  ;;  %v269_v26 = vld [vmem:[%s1320_s7 + $0x90] sm:$0xff]  ;;  %v250_v27 = vld [vmem:[#allocation7] sm:$0xff]  ;;  %v682_v50 = vld [vmem:[#allocation4 + $0x10] sm:$0xff] }
  0x67   : > { %381 = vmatpush1.msra.mxu1 %v253_v16  ;;  %414 = vmatprep.mubr.f32.mxu1 %v1161_v18  ;;  %v680_v43 = vld [vmem:[#allocation4] sm:$0xff]  ;;  %v681_v57 = vld [vmem:[#allocation4 + $0x8] sm:$0xff]  ;;  %v683_v59 = vld [vmem:[#allocation4 + $0x18] sm:$0xff]  ;;  %v638_v15 = vadd.s32 %v635_v11, %v633_v10  ;;  %v637_v16 = vadd.s32 %v635_v11, %v632_v12  ;;  %vm640_vm6 = vcmp.lt.s32.totalorder %v636_v14, 3000 }
  0x68   : > { %864 = vmatmul.mubr.msk.f32.vlgmr.msra.gmra.mxu0 %vm275_vm0, %v249_v17  ;;  %865 = vmatmul.mubr.msk.f32.vlgmr.msra.gmra.mxu1 %vm275_vm0, %v249_v17  ;;  %v639_v17 = vadd.s32 %v635_v11, %v634_v13 }
  0x69   : > { %457 = vmatprep.subr.mxu0 %v272_v19  ;;  %528 = vmatprep.subr.mxu1 %v274_v20  ;;  %vm642_vm7 = vcmp.lt.s32.totalorder %v638_v15, 3000  ;;  %vm641_vm8 = vcmp.lt.s32.totalorder %v637_v16, 3000 }
  0x6a   : > { %458 = vmatpush1.msra.mxu0 %v271_v21  ;;  %529 = vmatpush1.msra.mxu1 %v273_v22  ;;  %vm643_vm9 = vcmp.lt.s32.totalorder %v639_v17, 3000 }
  0x6b   : > { %459 = vmatprep.subr.mxu0 %v268_v23  ;;  %530 = vmatprep.subr.mxu1 %v270_v24 }
  0x6c   : > { %460 = vmatpush1.msra.mxu0 %v267_v25  ;;  %493 = vmatprep.mubr.f32.mxu0 %v1161_v18 }
  0x6d   : > { %531 = vmatpush1.msra.mxu1 %v269_v26  ;;  %564 = vmatprep.mubr.f32.mxu1 %v1161_v18 }
  0x6e   : > { %866 = vmatmul.mubr.msk.f32.vlgmr.msra.gmra.mxu0 %vm425_vm1, %v250_v27  ;;  %867 = vmatmul.mubr.msk.f32.vlgmr.msra.gmra.mxu1 %vm425_vm1, %v250_v27 }
 0x128   : > { %v345_v28 = vpop.f32.mrf.mxu0  ;;  %v416_v29 = vpop.f32.mrf.mxu1 }
 0x129   : > { %v1362_v30 = vmul.f32 0.1, %v345_v28  ;;  %v1364_v31 = vmul.f32 0.1, %v416_v29 }
 0x12a   : > { %v347_v32 = vpop.f32.mrf.mxu0  ;;  %v418_v33 = vpop.f32.mrf.mxu1 }
 0x12b   : > { %v583_v34 = vand.u32 2147483647, %v1362_v30  ;;  %v585_v35 = vand.u32 2147483647, %v1364_v31  ;;  %v1368_v36 = vmul.f32 0.1, %v347_v32 }
 0x12c   : > { %v1370_v37 = vmul.f32 0.1, %v418_v33  ;;  %v611_v21 = vmax.f32 %v1362_v30, 0.0  ;;  %v613_v23 = vmax.f32 %v1364_v31, 0.0 }
 0x12d   : > { %v587_v38 = vsub.f32 0.0, %v583_v34  ;;  %v589_v39 = vsub.f32 0.0, %v585_v35  ;;  %v584_v40 = vand.u32 2147483647, %v1368_v36  ;;  %v612_v29 = vmax.f32 %v1368_v36, 0.0 }
 0x12e   : > { %v586_v41 = vand.u32 2147483647, %v1370_v37  ;;  %v495_v42 = vpop.f32.mrf.mxu0  ;;  %v566_v44 = vpop.f32.mrf.mxu1  ;;  %v614_v34 = vmax.f32 %v1370_v37, 0.0 }
 0x12f   : > { %v591_v45 = vmul.f32 1.442695, %v587_v38  ;;  %v595_v46 = vmul.f32 1.442695, %v589_v39  ;;  %vm571_vm2 = vcmp.gt.f32.partialorder %v495_v42, 0.0  ;;  %vm573_vm3 = vcmp.gt.f32.partialorder %v566_v44, 0.0 }
 0x130   : > { %v588_v47 = vsub.f32 0.0, %v584_v40  ;;  %v590_v48 = vsub.f32 0.0, %v586_v41  ;;  %v1375_v49 = vsel %vm571_vm2, 1.0, %v1161_v18  ;;  %v497_v51 = vpop.f32.mrf.mxu0  ;;  %v568_v52 = vpop.f32.mrf.mxu1  ;;  %v1379_v56 = vsel %vm573_vm3, 1.0, %v1161_v18  ;;  %v644_v38 = vld [vmem:[#allocation2 + $0x10] sm:$0xff]  ;;  %v660_v39 = vld [vmem:[#allocation3] sm:$0xff] }
 0x131   : > { %982 = vpow2.f32 %v591_v45  ;;  %v684_v53 = vadd.f32 %v1375_v49, %v680_v43  ;;  %v686_v58 = vadd.f32 %v1379_v56, %v682_v50  ;;  %vm572_vm4 = vcmp.gt.f32.partialorder %v497_v51, 0.0  ;;  %v662_v42 = vld [vmem:[#allocation3 + $0x8] sm:$0xff] }
 0x132   : > { %984 = vpow2.f32 %v595_v46  ;;  %v593_v54 = vmul.f32 1.442695, %v588_v47  ;;  %v597_v55 = vmul.f32 1.442695, %v590_v48  ;;  %vm574_vm5 = vcmp.gt.f32.partialorder %v568_v52, 0.0  ;;  %v645_v52 = vld [vmem:[#allocation2] sm:$0xff] }
 0x133   : > { %688 = vst [vmem:[#allocation4] sm:$0xff] %v684_v53  ;;  %v1383_v60 = vsel %vm572_vm4, 1.0, %v1161_v18  ;;  %690 = vst [vmem:[#allocation4 + $0x10] sm:$0xff] %v686_v58  ;;  %v1387_v62 = vsel %vm574_vm5, 1.0, %v1161_v18  ;;  %v619_v26 = vmul.f32 %v1375_v49, %v1362_v30  ;;  %v621_v32 = vmul.f32 %v1379_v56, %v1364_v31  ;;  %v646_v30 = vld [vmem:[#allocation2 + $0x18] sm:$0xff]  ;;  %v647_v58 = vld [vmem:[#allocation2 + $0x8] sm:$0xff] }
 0x134   : > { %986 = vpow2.f32 %v593_v54  ;;  %v685_v61 = vadd.f32 %v1383_v60, %v681_v57  ;;  %v687_v63 = vadd.f32 %v1387_v62, %v683_v59  ;;  %vm664_vm10 = vcmp.gt.f32.partialorder %v1375_v49, 0.0 }
 0x135   : > { %988 = vpow2.f32 %v597_v55  ;;  %vm666_vm11 = vcmp.gt.f32.partialorder %v1379_v56, 0.0  ;;  %v620_v44 = vmul.f32 %v1383_v60, %v1368_v36  ;;  %v622_v47 = vmul.f32 %v1387_v62, %v1370_v37  ;;  %v661_v56 = vld [vmem:[#allocation3 + $0x18] sm:$0xff]  ;;  %v663_v36 = vld [vmem:[#allocation3 + $0x10] sm:$0xff] }
 0x136   : > { %689 = vst [vmem:[#allocation4 + $0x8] sm:$0xff] %v685_v61  ;;  %691 = vst [vmem:[#allocation4 + $0x18] sm:$0xff] %v687_v63  ;;  %vm665_vm12 = vcmp.gt.f32.partialorder %v1383_v60, 0.0  ;;  %vm667_vm13 = vcmp.gt.f32.partialorder %v1387_v62, 0.0 }
 0x13e   : > { %v983_v0 = vpop.eup %982 }
 0x13f   : > { %v985_v1 = vpop.eup %984  ;;  %v599_v2 = vadd.f32 1.0, %v983_v0 }
 0x140   : > { %v601_v3 = vadd.f32 1.0, %v985_v1 }
 0x141   : > { %v987_v5 = vpop.eup %986  ;;  %990 = vlog2.f32 %v599_v2 }
 0x142   : > { %v989_v6 = vpop.eup %988  ;;  %992 = vlog2.f32 %v601_v3  ;;  %v600_v7 = vadd.f32 1.0, %v987_v5 }
 0x143   : > { %v602_v8 = vadd.f32 1.0, %v989_v6 }
 0x144   : > { %994 = vlog2.f32 %v600_v7 }
 0x145   : > { %996 = vlog2.f32 %v602_v8 }
 0x14e   : > { %v991_v18 = vpop.eup %990 }
 0x14f   : > { %v993_v19 = vpop.eup %992  ;;  %v604_v20 = vmul.f32 0.6931472, %v991_v18 }
 0x150   : > { %v608_v22 = vmul.f32 0.6931472, %v993_v19 }
 0x151   : > { %v995_v24 = vpop.eup %994  ;;  %v615_v25 = vadd.f32 %v611_v21, %v604_v20 }
 0x152   : > { %v997_v27 = vpop.eup %996  ;;  %v617_v28 = vadd.f32 %v613_v23, %v608_v22  ;;  %v606_v33 = vmul.f32 0.6931472, %v995_v24 }
 0x153   : > { %v623_v35 = vsub.f32 %v615_v25, %v619_v26  ;;  %v610_v40 = vmul.f32 0.6931472, %v997_v27 }
 0x154   : > { %v625_v41 = vsub.f32 %v617_v28, %v621_v32  ;;  %v616_v43 = vadd.f32 %v612_v29, %v606_v33 }
 0x155   : > { %v648_v31 = vsel %vm640_vm6, %v623_v35, 0.0  ;;  %v668_v45 = vsel %vm664_vm10, %v623_v35, 0.0  ;;  %v618_v46 = vadd.f32 %v614_v34, %v610_v40 }
 0x156   : > { %v652_v48 = vadd.f32 %v648_v31, %v644_v38  ;;  %v672_v50 = vadd.f32 %v668_v45, %v660_v39  ;;  %v650_v49 = vsel %vm642_vm7, %v625_v41, 0.0  ;;  %v670_v51 = vsel %vm666_vm11, %v625_v41, 0.0 }
 0x157   : > { %v654_v53 = vadd.f32 %v650_v49, %v646_v30  ;;  %v674_v54 = vadd.f32 %v670_v51, %v662_v42  ;;  %v624_v55 = vsub.f32 %v616_v43, %v620_v44  ;;  %v626_v57 = vsub.f32 %v618_v46, %v622_v47 }
 0x158   : > { %656 = vst [vmem:[#allocation2 + $0x10] sm:$0xff] %v652_v48  ;;  %676 = vst [vmem:[#allocation3] sm:$0xff] %v672_v50 }
 0x159   : > { %658 = vst [vmem:[#allocation2 + $0x18] sm:$0xff] %v654_v53  ;;  %678 = vst [vmem:[#allocation3 + $0x8] sm:$0xff] %v674_v54  ;;  %v649_v37 = vsel %vm641_vm8, %v624_v55, 0.0  ;;  %v669_v59 = vsel %vm665_vm12, %v624_v55, 0.0  ;;  %v651_v61 = vsel %vm643_vm9, %v626_v57, 0.0  ;;  %v671_v63 = vsel %vm667_vm13, %v626_v57, 0.0 }
 0x15a   : > { %v653_v0 = vadd.f32 %v649_v37, %v645_v52  ;;  %v673_v1 = vadd.f32 %v669_v59, %v661_v56  ;;  %v655_v2 = vadd.f32 %v651_v61, %v647_v58  ;;  %v675_v3 = vadd.f32 %v671_v63, %v663_v36  ;;  %695 = sbr.rel (%p873_p8) target bundleno = 571 (0x23b), region = 52 }
 0x15c   : > { %657 = vst [vmem:[#allocation2] sm:$0xff] %v653_v0  ;;  %677 = vst [vmem:[#allocation3 + $0x18] sm:$0xff] %v673_v1 }
 0x15d   : > { %659 = vst [vmem:[#allocation2 + $0x8] sm:$0xff] %v655_v2  ;;  %679 = vst [vmem:[#allocation3 + $0x10] sm:$0xff] %v675_v3 }
 0x15f   : > { %v728_v60 = vld [vmem:[#allocation4] sm:$0xff]  ;;  %v729_v62 = vld [vmem:[#allocation4 + $0x8] sm:$0xff]  ;;  %v730_v5 = vld [vmem:[#allocation4 + $0x10] sm:$0xff]  ;;  %v745_v47 = vshrl.u32 %v630_v4, 7 }
 0x160   : > { %v732_v6 = vadd.f32 %v729_v62, %v728_v60  ;;  %v696_v7 = vld [vmem:[#allocation2 + $0x10] sm:$0xff]  ;;  %v731_v9 = vld [vmem:[#allocation4 + $0x18] sm:$0xff]  ;;  %v712_v12 = vld [vmem:[#allocation3] sm:$0xff] }
 0x161   : > { %v698_v10 = vld [vmem:[#allocation2 + $0x18] sm:$0xff]  ;;  %v714_v16 = vld [vmem:[#allocation3 + $0x8] sm:$0xff]  ;;  %vm747_vm14 = vcmp.eq.s32.totalorder %v745_v47, 1  ;;  %vm746_vm15 = vcmp.eq.s32.totalorder %v745_v47, 0 }
 0x162   : > { %v733_v13 = vadd.f32 %v732_v6, %v730_v5 }
 0x163   : > { %v697_v8 = vld [vmem:[#allocation2] sm:$0xff]  ;;  %v713_v15 = vld [vmem:[#allocation3 + $0x18] sm:$0xff] }
 0x164   : > { %v700_v11 = vadd.f32 %v697_v8, %v696_v7  ;;  %v699_v14 = vld [vmem:[#allocation2 + $0x8] sm:$0xff]  ;;  %v716_v18 = vadd.f32 %v713_v15, %v712_v12  ;;  %v734_v19 = vadd.f32 %v733_v13, %v731_v9  ;;  %v715_v20 = vld [vmem:[#allocation3 + $0x10] sm:$0xff] }
 0x166   : > { %v701_v17 = vadd.f32 %v700_v11, %v698_v10  ;;  %v717_v22 = vadd.f32 %v716_v18, %v714_v16  ;;  %735 = vadd.xlane.f32.xlu1 %v734_v19 }
 0x168   : > { %v702_v21 = vadd.f32 %v701_v17, %v699_v14  ;;  %v718_v23 = vadd.f32 %v717_v22, %v715_v20 }
 0x16a   : > { %703 = vadd.xlane.f32.xlu0 %v702_v21 }
 0x16e   : > { %719 = vadd.xlane.f32.xlu0 %v718_v23 }
 0x1ef   : > { %v736_v24 = vpop.xlane.xlu1 %735 }
 0x1f0   : > { %v737_v25 = vrot.slane %v736_v24, 4 }
 0x1f2   : > { %v738_v28 = vadd.f32 %v737_v25, %v736_v24 }
 0x1f3   : > { %v704_v26 = vpop.xlane.xlu0 %703 }
 0x1f4   : > { %v705_v27 = vrot.slane %v704_v26, 4  ;;  %v739_v32 = vrot.slane %v738_v28, 2 }
 0x1f6   : > { %v706_v29 = vadd.f32 %v705_v27, %v704_v26  ;;  %v740_v40 = vadd.f32 %v739_v32, %v738_v28 }
 0x1f7   : > { %v720_v33 = vpop.xlane.xlu0 %719 }
 0x1f8   : > { %v707_v34 = vrot.slane %v706_v29, 2  ;;  %v721_v35 = vrot.slane %v720_v33, 4  ;;  %v741_v44 = vrot.slane %v740_v40, 1 }
 0x1fa   : > { %v722_v38 = vadd.f32 %v721_v35, %v720_v33  ;;  %v708_v39 = vadd.f32 %v707_v34, %v706_v29  ;;  %v742_v46 = vadd.f32 %v741_v44, %v740_v40 }
 0x1fc   : > { %v723_v41 = vrot.slane %v722_v38, 2  ;;  %v709_v30 = vrot.slane %v708_v39, 1 }
 0x1fe   : > { %v724_v42 = vadd.f32 %v723_v41, %v722_v38  ;;  %v710_v43 = vadd.f32 %v709_v30, %v708_v39 }
 0x200   : > { %879 = vpush %v710_v43  ;;  %v725_v31 = vrot.slane %v724_v42, 1 }
 0x202   : > { %v726_v45 = vadd.f32 %v725_v31, %v724_v42 }
 0x204   : > { %881 = vpush %v726_v45 }
 0x205   : > { %883 = vpush %v742_v46 }
 0x231   : > { %s880_s15 = spop %879 }
 0x232   : > { %v751_v49 = vstv %s880_s15 }
 0x235   : > { %s882_s16 = spop %881 }
 0x236   : > { %v748_v48 = vstv %s882_s16  ;;  %s884_s28 = spop %883 }
 0x237   : > { %v749_v50 = vstv %s884_s28 }
 0x238   : > { %v750_v51 = vsel %vm747_vm14, %v748_v48, %v749_v50 }
 0x239   : > { %v752_v52 = vsel %vm746_vm15, %v751_v49, %v750_v51 }
 0x23a   : > { %753 = vst [vmem:[%s1331_s30] sm:$0x7] %v752_v52 }
 0x23b PF: > { %s15_s19 = sadd.s32 1, %s1152_s19   ;;  %s1461_s12 = smov %s1128_s13 }
 0x23c   : > { %p12_p11 = scmp.ge.s32.totalorder %s15_s19, 8   ;;  %s1462_s13 = smov %s1132_s14 }
 0x23d   : > { %s1463_s14 = smov %s1305_s5  ;;  %s1464_s15 = smov %s1144_s17 }
 0x23e   : > { %s1465_s16 = smov %s1148_s18  ;;  %s1466_s17 = smov %s1469_s9 }
 0x23f   : > { %s1467_s18 = smov %s1473_s11  ;;  %14 = sbr.rel (!%p12_p11) target bundleno = 7 (0x7), region = 87 }
 0x244   :  { %773 = vsyncpa [#allocation6], 1 }
 0x245   :  { %775 = vsyncpa [#allocation6 + $0x1], 1 }
 0x246   :  { %776 = vsyncpa [#allocation8], 1 }

</bundles_post_ra>
